<compile_context>
chip_gen: v6e
topology: v6e:2x2x1
jax: 0.10.0
libtpu: 0.0.40
codegen_flags: <defaults>
</compile_context>

<pallas_src>
import functools

import jax
import jax.numpy as jnp
from jax.experimental import pallas as pl
from jax.experimental.pallas import tpu as pltpu

LN_EPS = 1e-5

_VMEM_LIMIT = 48 * 1024 * 1024      # headroom under v7x's 64 MiB physical VMEM
_TILE_BUDGET = 24 * 1024 * 1024     # VMEM earmarked for the pipelined tiles
_MAX_TILE_ROWS = 1024               # v5e/v6e (128 MiB VMEM) fit 1024-row tiles


def _round_up(n, m):
    return ((n + m - 1) // m) * m


def _per_row_bytes(c, n_pad, in_bytes, out_bytes):
    # 2 hp input streams + output tile (double-buffered) plus the in-kernel f32
    # copies (a0/a1), bf16 staging (y0/y1) and the f32 accumulator (rough).
    return (2 * 2 * (2 * c) * in_bytes
            + 2 * n_pad * out_bytes
            + (2 * c) * 12 + n_pad * 4)


def _fixed_bytes(c, n_pad):
    # Grid-invariant operands (gamma-folded bf16 weight + f32 bias).  Their
    # index_map is constant so they are fetched once, but the pipeline still
    # double-buffers them; we budget for that copy instead of using Buffered(1).
    return 2 * (2 * (2 * c) * n_pad * 2 + n_pad * 4)


def _choose_h_tile(B, H2, W2, c, n_pad, in_bytes, out_bytes):
    """Largest th | H2 whose th*W2-row tile fits the VMEM budget; keep >=2 grid
    steps when possible so the parallel axes can shard across v7x's 2 TCs."""
    avail = max(_TILE_BUDGET - _fixed_bytes(c, n_pad), 2 * 1024 * 1024)
    per_row = _per_row_bytes(c, n_pad, in_bytes, out_bytes)
    divs = [d for d in range(H2, 0, -1) if H2 % d == 0]
    th = 1
    for d in divs:
        rows = d * W2
        if rows <= _MAX_TILE_ROWS and rows * per_row <= avail:
            th = d
            break
    if B * (H2 // th) < 2 and th > 1:
        th = divs[divs.index(th) + 1]      # give the second TensorCore work
    return th


def _choose_row_tile(rows, c, n_pad, in_bytes, out_bytes):
    """Fallback-path row tile: multiple of 8, <=1024, VMEM-budgeted, >=2 steps."""
    avail = max(_TILE_BUDGET - _fixed_bytes(c, n_pad), 2 * 1024 * 1024)
    per_row = _per_row_bytes(c, n_pad, in_bytes, out_bytes)
    t = int(min(_MAX_TILE_ROWS, avail // per_row)) // 8 * 8
    t = max(8, min(t, _round_up(rows, 8)))
    if rows > 8 and _round_up(rows, t) // t < 2:
        t = max(8, _round_up((rows + 1) // 2, 8))
    return t


def _merge_ln_matmul_kernel(xh0_ref, xh1_ref, w_ref, b_ref, o_ref, *, inv_4c):
    # xh{0,1}_ref: (th, W/2, 2C) fused path / (rows, 2C) fallback — the even /
    #              odd image rows; the lane dim already holds the (wp=0|wp=1)
    #              channel pair of one merged-patch position.
    # w_ref: (2, 2C, Npad) bf16  gamma-folded reduction weight, split by hp.
    # b_ref: (1, Npad)     f32   beta @ W^T, lane-padded.
    # o_ref: (rows, Npad)
    a0 = xh0_ref[...].astype(jnp.float32)
    a1 = xh1_ref[...].astype(jnp.float32)
    a0 = a0.reshape(-1, a0.shape[-1])      # layout-free: W/2 % 8 == 0 (fused)
    a1 = a1.reshape(-1, a1.shape[-1])      # or already 2-D (fallback)

    # One-pass LayerNorm statistics over the full 4C feature vector.
    s = jnp.sum(a0, axis=-1, keepdims=True) + jnp.sum(a1, axis=-1, keepdims=True)
    ss = (jnp.sum(a0 * a0, axis=-1, keepdims=True)
          + jnp.sum(a1 * a1, axis=-1, keepdims=True))
    mean = s * inv_4c
    var = jnp.maximum(ss * inv_4c - mean * mean, 0.0)
    rstd = jax.lax.rsqrt(var + LN_EPS)
    shift = -mean * rstd

    # Single fused per-row scale/shift (gamma lives in the weight, beta in the
    # output bias), then two bf16 MXU matmuls with f32 accumulation.
    wd = w_ref.dtype
    y0 = (a0 * rstd + shift).astype(wd)
    y1 = (a1 * rstd + shift).astype(wd)
    acc = jnp.dot(y0, w_ref[0], preferred_element_type=jnp.float32)
    acc = acc + jnp.dot(y1, w_ref[1], preferred_element_type=jnp.float32)
    o_ref[...] = (acc + b_ref[...]).astype(o_ref.dtype)


def patch_merging_pallas(x, gamma, beta, weight, input_resolution):
    """
    x:      (B, H*W, C)   (f32 or bf16)
    gamma:  (4C,)         LayerNorm weight
    beta:   (4C,)         LayerNorm bias
    weight: (2C, 4C)      torch-convention Linear weight (bias-free)
    returns (B, H*W//4, 2C) in x.dtype
    """
    H, W = input_resolution
    B, L, C = x.shape
    assert L == H * W, "input feature has wrong size"
    assert H % 2 == 0 and W % 2 == 0, f"x size ({H}*{W}) are not even."

    H2, W2 = H // 2, W // 2
    Lp = H2 * W2
    c2, c4, n_out = 2 * C, 4 * C, 2 * C
    n_pad = _round_up(n_out, 128)          # lane-dense (unmasked) stores

    # ---- fold LayerNorm affine into the reduction weight / an output bias ----
    w_t = weight.astype(jnp.float32).T                    # (4C, 2C)
    wg = gamma.astype(jnp.float32)[:, None] * w_t         # gamma folded (f32)
    bias = (beta.astype(jnp.float32) @ w_t)[None, :]      # (1, 2C), f32
    # Split the 4C rows by hp parity to match each stream's [wp=0 | wp=1] lanes:
    # torch cat order is [(0,0),(1,0),(0,1),(1,1)] along the 4C axis.
    w_h0 = jnp.concatenate([wg[0:C], wg[2 * C:3 * C]], axis=0)       # hp = 0
    w_h1 = jnp.concatenate([wg[C:2 * C], wg[3 * C:4 * C]], axis=0)   # hp = 1
    w_stack = jnp.stack([w_h0, w_h1]).astype(jnp.bfloat16)           # (2, 2C, 2C)
    if n_pad != n_out:
        w_stack = jnp.pad(w_stack, ((0, 0), (0, 0), (0, n_pad - n_out)))
        bias = jnp.pad(bias, ((0, 0), (0, n_pad - n_out)))

    in_bytes = jnp.dtype(x.dtype).itemsize
    out_bytes = in_bytes
    kernel = functools.partial(_merge_ln_matmul_kernel, inv_4c=1.0 / c4)
    cparams = pltpu.CompilerParams(vmem_limit_bytes=_VMEM_LIMIT,
                                   dimension_semantics=("parallel", "parallel"))

    if W2 % 8 == 0:
        # ------ fully fused 2x2 gather: no pre-pass over x ------
        x5 = x.reshape(B, H2, 2, W2, c2)          # free reshape of contiguous x
        th = _choose_h_tile(B, H2, W2, C, n_pad, in_bytes, out_bytes)
        nH = H2 // th
        rows_per_step = th * W2

        def x_spec(hp):
            return pl.BlockSpec(
                (pl.Squeezed(), th, pl.Squeezed(), W2, c2),
                lambda b, i: (b, i, hp, 0, 0))

        out = pl.pallas_call(
            kernel,
            out_shape=jax.ShapeDtypeStruct((B * Lp, n_pad), x.dtype),
            grid_spec=pltpu.PrefetchScalarGridSpec(
                num_scalar_prefetch=0,
                grid=(B, nH),
                in_specs=[
                    x_spec(0),
                    x_spec(1),
                    pl.BlockSpec((2, c2, n_pad), lambda b, i: (0, 0, 0)),
                    pl.BlockSpec((1, n_pad), lambda b, i: (0, 0)),
                ],
                out_specs=pl.BlockSpec((rows_per_step, n_pad),
                                       lambda b, i: (b * nH + i, 0)),
            ),
            compiler_params=cparams,
        )(x5, x5, w_stack, bias)
        if n_pad != n_out:
            out = out[:, :n_out]
        return out.reshape(B, Lp, n_out)

    # ------ fallback: W/2 not a multiple of 8, so the in-kernel rank merge would
    # not be layout-free.  Split the hp parity with two XLA strided slices (one
    # extra pass over x) and run the same kernel on plain 2-D row tiles. ------
    x5 = x.reshape(B, H2, 2, W2 * c2)
    xh0 = x5[:, :, 0, :].reshape(B * Lp, c2)
    xh1 = x5[:, :, 1, :].reshape(B * Lp, c2)
    rows = B * Lp
    row_tile = _choose_row_tile(rows, C, n_pad, in_bytes, out_bytes)
    padded = _round_up(rows, row_tile)
    if padded != rows:
        pad = ((0, padded - rows), (0, 0))
        xh0 = jnp.pad(xh0, pad)
        xh1 = jnp.pad(xh1, pad)

    out = pl.pallas_call(
        kernel,
        out_shape=jax.ShapeDtypeStruct((padded, n_pad), x.dtype),
        grid_spec=pltpu.PrefetchScalarGridSpec(
            num_scalar_prefetch=0,
            grid=(padded // row_tile,),
            in_specs=[
                pl.BlockSpec((row_tile, c2), lambda i: (i, 0)),
                pl.BlockSpec((row_tile, c2), lambda i: (i, 0)),
                pl.BlockSpec((2, c2, n_pad), lambda i: (0, 0, 0)),
                pl.BlockSpec((1, n_pad), lambda i: (0, 0)),
            ],
            out_specs=pl.BlockSpec((row_tile, n_pad), lambda i: (i, 0)),
        ),
        compiler_params=pltpu.CompilerParams(
            vmem_limit_bytes=_VMEM_LIMIT,
            dimension_semantics=("parallel",)),
    )(xh0, xh1, w_stack, bias)
    out = out[:rows, :n_out]
    return out.reshape(B, Lp, n_out)


def patch_merging_reference(x, gamma, beta, weight, input_resolution):
    """Pure-JAX f32 reference mirroring the torch forward exactly."""
    H, W = input_resolution
    B, L, C = x.shape
    xg = x.reshape(B, H, W, C)
    x0 = xg[:, 0::2, 0::2, :]
    x1 = xg[:, 1::2, 0::2, :]
    x2 = xg[:, 0::2, 1::2, :]
    x3 = xg[:, 1::2, 1::2, :]
    xm = jnp.concatenate([x0, x1, x2, x3], axis=-1).reshape(B, -1, 4 * C)
    mean = jnp.mean(xm, axis=-1, keepdims=True)
    var = jnp.mean((xm - mean) ** 2, axis=-1, keepdims=True)
    xn = (xm - mean) / jnp.sqrt(var + LN_EPS)
    y = xn * gamma + beta
    return jnp.einsum("blk,ok->blo", y, weight)


if __name__ == "__main__":
    root = jax.random.PRNGKey(0)
    keys = jax.random.split(root, 3)
    # (B, H, W, C):
    #   1) fused-gather path, lane padding 2C=64 -> 128
    #   2) fused path with 2C=192 -> padded to 256 (multiple-of-128 rule)
    #   3) fallback path (W//2 = 6, not a multiple of 8)
    configs = [(2, 16, 16, 32), (1, 16, 16, 96), (2, 12, 12, 32)]
    for idx, (key, (B, H, W, C)) in enumerate(zip(keys, configs)):
        kx, kw, kg, kb = jax.random.split(key, 4)
        x = jax.random.normal(kx, (B, H * W, C), dtype=jnp.float32)
        gamma = 1.0 + 0.1 * jax.random.normal(kg, (4 * C,), dtype=jnp.float32)
        beta = 0.05 * jax.random.normal(kb, (4 * C,), dtype=jnp.float32)
        weight = 0.02 * jax.random.normal(kw, (2 * C, 4 * C), dtype=jnp.float32)

        ref = patch_merging_reference(x, gamma, beta, weight, (H, W))
        out = jax.block_until_ready(
            patch_merging_pallas(x, gamma, beta, weight, (H, W)))
        assert out.shape == (B, (H // 2) * (W // 2), 2 * C)
        assert jnp.allclose(out, ref, atol=2e-2, rtol=2e-2)

        if idx == 0:
            # bf16 activations: fused path reads them natively (half the input
            # DMA on v5e/v6e); LN statistics still computed in f32 in-kernel.
            xb = x.astype(jnp.bfloat16)
            ref_b = patch_merging_reference(
                xb.astype(jnp.float32), gamma, beta, weight, (H, W))
            out_b = jax.block_until_ready(
                patch_merging_pallas(xb, gamma, beta, weight, (H, W)))
            assert out_b.dtype == jnp.bfloat16
            assert jnp.allclose(out_b.astype(jnp.float32), ref_b,
                                atol=8e-2, rtol=8e-2)

    print("KERNEL_OK")
</pallas_src>

<mosaic_0001>
module attributes {stable_mosaic.version = 11 : i64} {
  func.func @_merge_ln_matmul_kernel(%arg0: i32, %arg1: i32, %arg2: memref<1x8x1x8x64xf32, #tpu.memory_space<vmem>>, %arg3: memref<1x8x1x8x64xf32, #tpu.memory_space<vmem>>, %arg4: memref<2x64x128xbf16, #tpu.memory_space<vmem>>, %arg5: memref<1x128xf32, #tpu.memory_space<vmem>>, %arg6: memref<64x128xf32, #tpu.memory_space<vmem>>) attributes {dimension_semantics = [#tpu.dimension_semantics<parallel>, #tpu.dimension_semantics<parallel>], iteration_bounds = array<i64: 2, 1>, scalar_prefetch = 0 : i64, scratch_operands = 0 : i64, tpu.core_type = #tpu.core_type<tc>, window_params = [{transform_indices = @transform_0, window_bounds = array<i64: 1, 8, 1, 8, 64>}, {transform_indices = @transform_1, window_bounds = array<i64: 1, 8, 1, 8, 64>}, {pipeline_mode = #tpu.pipeline_mode<synchronous>, transform_indices = @transform_2, window_bounds = array<i64: 2, 64, 128>}, {pipeline_mode = #tpu.pipeline_mode<synchronous>, transform_indices = @transform_3, window_bounds = array<i64: 1, 128>}, {transform_indices = @transform_4, window_bounds = array<i64: 64, 128>}]} {
    %c0 = arith.constant 0 : index
    %c0_0 = arith.constant 0 : index
    %c0_1 = arith.constant 0 : index
    %c0_2 = arith.constant 0 : index
    %c0_3 = arith.constant 0 : index
    %0 = vector.load %arg2[%c0, %c0_0, %c0_1, %c0_2, %c0_3] : memref<1x8x1x8x64xf32, #tpu.memory_space<vmem>>, vector<1x8x1x8x64xf32>
    %1 = vector.shape_cast %0 : vector<1x8x1x8x64xf32> to vector<8x8x64xf32>
    %c0_4 = arith.constant 0 : index
    %c0_5 = arith.constant 0 : index
    %c0_6 = arith.constant 0 : index
    %c0_7 = arith.constant 0 : index
    %c0_8 = arith.constant 0 : index
    %2 = vector.load %arg3[%c0_4, %c0_5, %c0_6, %c0_7, %c0_8] : memref<1x8x1x8x64xf32, #tpu.memory_space<vmem>>, vector<1x8x1x8x64xf32>
    %3 = vector.shape_cast %2 : vector<1x8x1x8x64xf32> to vector<8x8x64xf32>
    %4 = vector.shape_cast %1 : vector<8x8x64xf32> to vector<64x64xf32>
    %5 = vector.shape_cast %3 : vector<8x8x64xf32> to vector<64x64xf32>
    %cst = arith.constant dense<0.000000e+00> : vector<64xf32>
    %6 = vector.multi_reduction <add>, %4, %cst [1] : vector<64x64xf32> to vector<64xf32>
    %7 = vector.shape_cast %6 : vector<64xf32> to vector<64x1xf32>
    %cst_9 = arith.constant dense<0.000000e+00> : vector<64xf32>
    %8 = vector.multi_reduction <add>, %5, %cst_9 [1] : vector<64x64xf32> to vector<64xf32>
    %9 = vector.shape_cast %8 : vector<64xf32> to vector<64x1xf32>
    %10 = arith.addf %7, %9 : vector<64x1xf32>
    %11 = arith.mulf %4, %4 : vector<64x64xf32>
    %cst_10 = arith.constant dense<0.000000e+00> : vector<64xf32>
    %12 = vector.multi_reduction <add>, %11, %cst_10 [1] : vector<64x64xf32> to vector<64xf32>
    %13 = vector.shape_cast %12 : vector<64xf32> to vector<64x1xf32>
    %14 = arith.mulf %5, %5 : vector<64x64xf32>
    %cst_11 = arith.constant dense<0.000000e+00> : vector<64xf32>
    %15 = vector.multi_reduction <add>, %14, %cst_11 [1] : vector<64x64xf32> to vector<64xf32>
    %16 = vector.shape_cast %15 : vector<64xf32> to vector<64x1xf32>
    %17 = arith.addf %13, %16 : vector<64x1xf32>
    %cst_12 = arith.constant 7.812500e-03 : f32
    %18 = vector.broadcast %cst_12 : f32 to vector<64x1xf32>
    %19 = arith.mulf %10, %18 : vector<64x1xf32>
    %cst_13 = arith.constant 7.812500e-03 : f32
    %20 = vector.broadcast %cst_13 : f32 to vector<64x1xf32>
    %21 = arith.mulf %17, %20 : vector<64x1xf32>
    %22 = arith.mulf %19, %19 : vector<64x1xf32>
    %23 = arith.subf %21, %22 : vector<64x1xf32>
    %cst_14 = arith.constant 0.000000e+00 : f32
    %24 = vector.broadcast %cst_14 : f32 to vector<64x1xf32>
    %25 = arith.maximumf %23, %24 : vector<64x1xf32>
    %cst_15 = arith.constant 9.99999974E-6 : f32
    %26 = vector.broadcast %cst_15 : f32 to vector<64x1xf32>
    %27 = arith.addf %25, %26 : vector<64x1xf32>
    %28 = math.rsqrt %27 : vector<64x1xf32>
    %cst_16 = arith.constant 0.000000e+00 : f32
    %29 = vector.broadcast %cst_16 : f32 to vector<64x1xf32>
    %30 = arith.subf %29, %19 : vector<64x1xf32>
    %31 = arith.mulf %30, %28 : vector<64x1xf32>
    %32 = vector.broadcast %28 : vector<64x1xf32> to vector<64x64xf32>
    %33 = arith.mulf %4, %32 : vector<64x64xf32>
    %34 = vector.broadcast %31 : vector<64x1xf32> to vector<64x64xf32>
    %35 = arith.addf %33, %34 : vector<64x64xf32>
    %36 = arith.truncf %35 : vector<64x64xf32> to vector<64x64xbf16>
    %37 = vector.broadcast %28 : vector<64x1xf32> to vector<64x64xf32>
    %38 = arith.mulf %5, %37 : vector<64x64xf32>
    %39 = vector.broadcast %31 : vector<64x1xf32> to vector<64x64xf32>
    %40 = arith.addf %38, %39 : vector<64x64xf32>
    %41 = arith.truncf %40 : vector<64x64xf32> to vector<64x64xbf16>
    %c0_17 = arith.constant 0 : index
    %c0_18 = arith.constant 0 : index
    %c0_19 = arith.constant 0 : index
    %42 = vector.load %arg4[%c0_17, %c0_18, %c0_19] : memref<2x64x128xbf16, #tpu.memory_space<vmem>>, vector<1x64x128xbf16>
    %43 = vector.shape_cast %42 : vector<1x64x128xbf16> to vector<64x128xbf16>
    %cst_20 = arith.constant dense<0.000000e+00> : vector<64x128xf32>
    %44 = tpu.matmul %36, %43, %cst_20 {dimension_numbers = #tpu.dot_dimension_numbers<[1], [0], [0], [1], [0, 0, 1, 1], [], []>} : vector<64x64xbf16>, vector<64x128xbf16>, vector<64x128xf32> -> vector<64x128xf32>
    %c1 = arith.constant 1 : index
    %c0_21 = arith.constant 0 : index
    %c0_22 = arith.constant 0 : index
    %45 = vector.load %arg4[%c1, %c0_21, %c0_22] : memref<2x64x128xbf16, #tpu.memory_space<vmem>>, vector<1x64x128xbf16>
    %46 = vector.shape_cast %45 : vector<1x64x128xbf16> to vector<64x128xbf16>
    %cst_23 = arith.constant dense<0.000000e+00> : vector<64x128xf32>
    %47 = tpu.matmul %41, %46, %cst_23 {dimension_numbers = #tpu.dot_dimension_numbers<[1], [0], [0], [1], [0, 0, 1, 1], [], []>} : vector<64x64xbf16>, vector<64x128xbf16>, vector<64x128xf32> -> vector<64x128xf32>
    %48 = arith.addf %44, %47 : vector<64x128xf32>
    %c0_24 = arith.constant 0 : index
    %c0_25 = arith.constant 0 : index
    %49 = vector.load %arg5[%c0_24, %c0_25] : memref<1x128xf32, #tpu.memory_space<vmem>>, vector<1x128xf32>
    %50 = vector.broadcast %49 : vector<1x128xf32> to vector<64x128xf32>
    %51 = arith.addf %48, %50 : vector<64x128xf32>
    %c0_26 = arith.constant 0 : index
    %c0_27 = arith.constant 0 : index
    %52 = vector.load %arg6[%c0_26, %c0_27] : memref<64x128xf32, #tpu.memory_space<vmem>>, vector<64x128xf32>
    tpu.vector_store %arg6[%c0_26, %c0_27], %51 {strides = array<i32>} : memref<64x128xf32, #tpu.memory_space<vmem>>, vector<64x128xf32>,
    return
  }
  func.func @transform_0(%arg0: i32, %arg1: i32) -> (i32, i32, i32, i32, i32) {
    %c0_i32 = arith.constant 0 : i32
    %c0_i32_0 = arith.constant 0 : i32
    %c0_i32_1 = arith.constant 0 : i32
    %c0_i32_2 = arith.constant 0 : i32
    return %arg0, %arg1, %c0_i32, %c0_i32_0, %c0_i32_1 : i32, i32, i32, i32, i32
  }
  func.func @transform_1(%arg0: i32, %arg1: i32) -> (i32, i32, i32, i32, i32) {
    %c1_i32 = arith.constant 1 : i32
    %c0_i32 = arith.constant 0 : i32
    %c0_i32_0 = arith.constant 0 : i32
    %c0_i32_1 = arith.constant 0 : i32
    return %arg0, %arg1, %c1_i32, %c0_i32, %c0_i32_0 : i32, i32, i32, i32, i32
  }
  func.func @transform_2(%arg0: i32, %arg1: i32) -> (i32, i32, i32) {
    %c0_i32 = arith.constant 0 : i32
    %c0_i32_0 = arith.constant 0 : i32
    %c0_i32_1 = arith.constant 0 : i32
    %c0_i32_2 = arith.constant 0 : i32
    return %c0_i32, %c0_i32_0, %c0_i32_1 : i32, i32, i32
  }
  func.func @transform_3(%arg0: i32, %arg1: i32) -> (i32, i32) {
    %c0_i32 = arith.constant 0 : i32
    %c0_i32_0 = arith.constant 0 : i32
    %c0_i32_1 = arith.constant 0 : i32
    return %c0_i32, %c0_i32_0 : i32, i32
  }
  func.func @transform_4(%arg0: i32, %arg1: i32) -> (i32, i32) {
    %c1_i32 = arith.constant 1 : i32
    %0 = arith.muli %arg0, %c1_i32 : i32
    %1 = arith.addi %0, %arg1 : i32
    %c0_i32 = arith.constant 0 : i32
    %c0_i32_0 = arith.constant 0 : i32
    return %1, %c0_i32 : i32, i32
  }
}

</mosaic_0001>

<bundles_post_ra>
// kernel: tpu_custom_call.1
= control target key start
LH: loop header
LB: loop body
LE: loop exit
PB: predicated region body
PF: predicated region fallthrough
CT: control target
= control target key end

     0   :  { %s1745_s0 = inlined_call_operand.hbm [shape: f32[2,8,2,8,64], index: 0, kind: input, shape index: {}]   ;;  %s1746_s1 = inlined_call_operand.hbm [shape: f32[2,8,2,8,64], index: 1, kind: input, shape index: {}]   ;;  %s1747_s2 = inlined_call_operand.hbm [shape: bf16[2,64,128], index: 2, kind: input, shape index: {}]   ;;  %s1748_s3 = inlined_call_operand.vmem [shape: f32[1,128], index: 3, kind: input, shape index: {}]   ;;  %s1749_s4 = inlined_call_operand.hbm [shape: f32[128,128], index: 4, kind: output, shape index: {}]  }
   0x1   :  { %1757 = sst [smem:[#allocation18_spill]] %s1745_s0 }
   0x2   :  { %1758 = sst [smem:[#allocation19_spill]] %s1747_s2 }
   0x3   :  { %9 = vsyncpa [#allocation3], 0 }
   0x4   :  { %11 = vsyncpa [#allocation3 + $0x1], 0 }
   0x5   :  { %12 = vsyncpa [#allocation6], 0 }
   0x6   :  { %14 = vsyncpa [#allocation6 + $0x1], 0 }
   0x7   :  { %15 = vsyncpa [#allocation4], 0 }
   0x8   :  { %17 = vsyncpa [#allocation4 + $0x1], 0  ;;  %s1342_s15 = smov 0   ;;  %s1344_s16 = smov 0  }
   0x9   :  { %s1346_s17 = smov 0   ;;  %s1348_s18 = smov 0  }
   0xa   :  { %s1350_s19 = smov 0   ;;  %s1352_s20 = smov 0  }
   0xb LB: > { %1759 = sst [smem:[#allocation13_spill]] %s1284_s15  ;;  %s1373_s21 = sadd.s32 4294967295, %s1304_s20   ;;  %s1304_s20 = sphi %s1352_s20, %s23_s20   ;;  %s1300_s19 = sphi %s1350_s19, %s1789_s19   ;;  %s1296_s18 = sphi %s1348_s18, %s1788_s18   ;;  %s1292_s17 = sphi %s1346_s17, %s1784_s17   ;;  %s1288_s16 = sphi %s1344_s16, %s1787_s16   ;;  %s1284_s15 = sphi %s1342_s15, %s1786_s15  }
   0xc   : > { %1760 = sst [smem:[#allocation14_spill]] %s1292_s17  ;;  %s936_s22 = sadd.s32 4294967294, %s1304_s20  }
   0xd   : > { %p51_p0 = scmp.ne.s32.totalorder %s1292_s17, %s1288_s16  ;;  %p52_p1 = scmp.eq.s32.totalorder %s1304_s20, 0 }
   0xe   : > { %p57_p2 = scmp.ne.s32.totalorder %s1288_s16, %s1284_s15  ;;  %p1750_p3 = scmp.eq.s32.totalorder %s1373_s21, 0 }
   0xf   : > { %p153_p4 = scmp.eq.s32.totalorder %s1373_s21, 1  ;;  %p1384_p5 = por %p52_p1, %p51_p0 }
  0x10   : > { %p159_p6 = scmp.eq.s32.totalorder %s936_s22, 1  ;;  %p1390_p7 = por %p1750_p3, %p57_p2 }
  0x11   : > { %p1394_p8 = por %p153_p4, %p51_p0  ;;  %p937_p10 = scmp.ge.s32.totalorder %s1304_s20, 1 }
  0x12   : > { %s1762_s25 = scalar_select %p1390_p7, 1, 0 }
  0x13   : > { %s1763_s26 = scalar_select %p1394_p8, 1, 0 }
  0x14   : > { %p1398_p9 = por %p159_p6, %p57_p2  ;;  %p166_p11 = scmp.lt.s32.totalorder %s1304_s20, 3 }
  0x15   : > { %s1306_s29 = smov [#allocation7]   ;;  %p1050_p1 = scmp.lt.s32.totalorder %s1304_s20, 2 }
  0x16   : > { %s1764_s27 = scalar_select %p1398_p9, 1, 0 }
  0x17   : > { %p1404_p12 = pnand %p937_p10, %p166_p11  ;;  %s178_s30 = sshll.u32 %s1306_s29, 4  ;;  %s179_s30 = int_to_ptr.vmem [resolvable:$true] %s178_s30 }
  0x18   : > { %1765 = sst [smem:[#allocation15_spill]] %s1764_s27  ;;  %p1420_p2 = pnand %p1050_p1, %p1384_p5 }
  0x19   : > { %p1034_p13 = pneg %p1404_p12  ;;  %s35_s7 = sadd.s32 1, %s1300_s19 }
  0x1a   : > { %p1425_p6 = scmp.ge.s32.totalorder %s35_s7, 2  ;;  %s1144_s9 = scalar_lea.vmem %s179_s30, 1024 }
  0x1b   : > { %p1414_p4 = pnand %p1034_p13, %p1750_p3  ;;  %p1145_p11 = scmp.ne.s32.totalorder %s179_s30, %s1144_s9 }
  0x1c   : > { %p1152_p3 = scmp.lt.s32.totalorder %s179_s30, %s179_s30  ;;  %p1153_p9 = scmp.lt.s32.totalorder %s1144_s9, %s1144_s9 }
  0x1d   : > { %p1135_p10 = pneg %p1414_p4 }
  0x1e   : > { %p1154_p8 = por %p1153_p9, %p1152_p3 }
  0x1f   : > { %p1147_p0 = pnand %p1145_p11, %p1135_p10 }
  0x21   : > { %p1148_p13 = pneg %p1147_p0 }
  0x23   : > { %p1155_p7 = pnand %p1154_p8, %p1148_p13 }
  0x25   : > { %1158 = shalt.err (!%p1155_p7)
}
  0x26   : > { %s1307_s10 = smov 64   ;;  %s1308_s11 = smov 4  }
  0x27   : > { %s1770_s2 = sld [smem:[#allocation19_spill]]  ;;  %s195_s14 = sand.u32 1, %s1292_s17  }
  0x28   : > { %s1791_s7 = smov (%p1425_p6, %s35_s7), 0  ;;  %s1441_s22 = sshll.u32 %s195_s14, 6 }
  0x29   : > { %1771 = sst [smem:[#allocation16_spill]] %s1791_s7  ;;  %s39_s24 = ssub.s32 %s1300_s19, %s1791_s7 }
  0x2a   : > { %p42_p3 = scmp.eq.s32.totalorder %s39_s24, 0  ;;  %s973_s29 = sshll.u32 %s1300_s19, 11 }
  0x2b   : > { %s1772_s0 = sld [smem:[#allocation18_spill]]  ;;  %s199_s27 = scalar_lea.vmem [#allocation2], %s1441_s22 }
  0x2c   : > { %s209_s12 = sshll.u32 %s199_s27, 4  ;;  %s196_s8 = scalar_lea.sflag [#allocation3], %s195_s14  ;;  %s210_s12 = int_to_ptr.vmem [resolvable:$true] %s209_s12 }
  0x2d   : > { %1037 = dma.hbm_to_vmem [thread:$0]  (!%p1414_p4), %s1770_s2, 1024, %s179_s30, [#allocation6], %s1307_s10, %s1307_s10, %s1308_s11  }
  0x2e   : > { %s1773_s30 = sadd.s32 1, %s1292_s17  ;;  %p1161_p5 = pneg %p1420_p2 }
  0x2f   : > { %s1455_s10 = scalar_select %p42_p3, %s1292_s17, %s1773_s30  }
  0x30   : > { %s1172_s11 = scalar_lea.vmem %s210_s12, 1024  ;;  %s1309_s13 = smov [#allocation2]  }
  0x31   : > { %s208_s5 = scalar_lea.hbm %s1772_s0, %s973_s29  ;;  %1774 = sst [smem:[#allocation17_spill]] %s1455_s10 }
  0x32   : > { %p1173_p7 = scmp.ne.s32.totalorder %s210_s12, %s1172_s11  ;;  %s1177_s24 = sshll.u32 %s1309_s13, 4  ;;  %s1178_s24 = int_to_ptr.vmem [resolvable:$false] %s1177_s24 }
  0x33   : > { %s1179_s23 = scalar_lea.vmem %s1178_s24, 2048  ;;  %p1180_p0 = scmp.lt.s32.totalorder %s210_s12, %s1178_s24 }
  0x34   : > { %p1175_p8 = pnand %p1173_p7, %p1161_p5  ;;  %p1181_p1 = scmp.lt.s32.totalorder %s1179_s23, %s1172_s11 }
  0x36   : > { %p1176_p9 = pneg %p1175_p8  ;;  %p1182_p4 = por %p1181_p1, %p1180_p0 }
  0x38   : > { %p1183_p6 = pnand %p1182_p4, %p1176_p9 }
  0x3a   : > { %1186 = shalt.err (!%p1183_p6)
}
  0x3b   : > { %s1310_s27 = smov 256   ;;  %s1311_s14 = smov 128  }
  0x3c   : > { %s1312_s9 = smov 8   ;;  %s859_s0 = scalar_lea.hbm %s1746_s1, %s973_s29 }
  0x3d   : > { %1041 = dma.hbm_to_vmem [thread:$0]  (!%p1420_p2), %s208_s5, 1024, %s210_s12, %s196_s8, %s1310_s27, %s1311_s14, %s1312_s9  }
  0x3e   : > { %s860_s24 = scalar_lea.hbm %s859_s0, 128  ;;  %s223_s11 = scalar_lea.vmem [#allocation5], %s1441_s22 }
  0x3f   : > { %s234_s23 = sshll.u32 %s223_s11, 4  ;;  %s219_s2 = sand.u32 1, %s1304_s20   ;;  %s235_s23 = int_to_ptr.vmem [resolvable:$true] %s234_s23 }
  0x40   : > { %s220_s7 = scalar_lea.sflag [#allocation6], %s219_s2  ;;  %s1200_s10 = scalar_lea.vmem %s235_s23, 1024 }
  0x41   : > { %p1201_p10 = scmp.ne.s32.totalorder %s235_s23, %s1200_s10  ;;  %s1313_s17 = smov [#allocation5]  }
  0x42   : > { %s1205_s15 = sshll.u32 %s1313_s17, 4  ;;  %s1206_s15 = int_to_ptr.vmem [resolvable:$false] %s1205_s15 }
  0x43   : > { %p1203_p11 = pnand %p1201_p10, %p1161_p5  ;;  %s1207_s5 = scalar_lea.vmem %s1206_s15, 2048 }
  0x44   : > { %p1208_p3 = scmp.lt.s32.totalorder %s235_s23, %s1206_s15  ;;  %p1209_p7 = scmp.lt.s32.totalorder %s1207_s5, %s1200_s10 }
  0x45   : > { %p1204_p13 = pneg %p1203_p11 }
  0x46   : > { %p1210_p8 = por %p1209_p7, %p1208_p3 }
  0x48   : > { %p1211_p9 = pnand %p1210_p8, %p1204_p13 }
  0x4a   : > { %1214 = shalt.err (!%p1211_p9)
}
  0x4b   : > { %1044 = dma.hbm_to_vmem [thread:$0]  (!%p1420_p2), %s860_s24, 1024, %s235_s23, %s220_s7, %s1310_s27, %s1311_s14, %s1312_s9  }
  0x4c   : > { %246 = sbr.rel (%p1404_p12) target bundleno = 536 (0x218), region = 36  ;;  %s1479_s0 = sand.u32 (!%p1404_p12), 1, %s1288_s16  }
  0x4d   : > { %s1482_s2 = sshll.u32 (!%p1404_p12), %s1479_s0, 6  ;;  %s249_s15 = scalar_lea.sflag (!%p1404_p12), [#allocation3], %s1479_s0 }
  0x4e   : > { %s1486_s17 = scalar_lea.vmem (!%p1404_p12), [#allocation2], %s1482_s2  ;;  %p1775_p5 = scmp.ne.s32.totalorder (!%p1404_p12), %s1762_s25, 0 }
  0x51   : > { %1267 = dma.done.wait (%p1775_p5), %s249_s15, 1024  }
  0x52   : > { %1269 = vsyncadd (%p1775_p5), %s249_s15, 4294966272  ;;  %s257_s28 = sand.u32 1, %s1373_s21   ;;  %s1494_s7 = scalar_lea.vmem [#allocation5], %s1482_s2 }
  0x53   : > { %s258_s6 = scalar_lea.sflag [#allocation6], %s257_s28 }
  0x54   : > { %1271 = dma.done.wait (%p1775_p5), %s258_s6, 1024  }
  0x55   : > { %1273 = vsyncadd (%p1775_p5), %s258_s6, 4294966272  ;;  %p1776_p12 = scmp.eq.s32.totalorder %s1373_s21, 0 }
  0x57   : > { %1275 = dma.done.wait (%p1776_p12), [#allocation6], 1024   ;;  %p1777_p2 = pmov %p1776_p12 }
  0x58   : > { %vm316_vm0 = vcmask 523264   ;;  %v1505_v0 = vld [vmem:[%s1494_s7] sm:$0xff]  ;;  %v1511_v2 = vld [vmem:[%s1494_s7 + $0x8] sm:$0xff]  ;;  %v1525_v8 = vld [vmem:[%s1486_s17 + $0x18] sm:$0xff]  ;;  %s1680_s22 = scalar_lea.vmem [#allocation8], %s1482_s2  ;;  %s975_s12 = sshll.u32 %s1296_s18, 10 }
  0x59   : > { %1277 = vsyncadd (%p1777_p2), [#allocation6], 4294966272  ;;  %v1508_v1 = vld [vmem:[%s1486_s17] sm:$0xff]  ;;  %v341_v3 = vsel %vm316_vm0, %v1505_v0, 0.0  ;;  %v1518_v5 = vld [vmem:[%s1486_s17 + $0x8] sm:$0xff]  ;;  %v344_v6 = vsel %vm316_vm0, %v1511_v2, 0.0  ;;  %v406_v20 = vmul.f32 %v1511_v2, %v1511_v2  ;;  %v405_v21 = vmul.f32 %v1505_v0, %v1505_v0  ;;  %s1695_s27 = scalar_lea.hbm %s1749_s4, %s975_s12 }
  0x5a   : > { %v317_v4 = vsel %vm316_vm0, %v1508_v1, 0.0  ;;  %342 = vadd.xlane.f32.xlu1 %v341_v3  ;;  %v320_v7 = vsel %vm316_vm0, %v1518_v5, 0.0  ;;  %v1528_v9 = vld [vmem:[%s1486_s17 + $0x10] sm:$0xff]  ;;  %v326_v10 = vsel %vm316_vm0, %v1525_v8, 0.0  ;;  %v1535_v12 = vld [vmem:[%s1494_s7 + $0x18] sm:$0xff]  ;;  %v374_v16 = vmul.f32 %v1518_v5, %v1518_v5  ;;  %v1569_v32 = vld [vmem:[%s1486_s17 + $0x28] sm:$0xff] }
  0x5b   : > { %318 = vadd.xlane.f32.xlu0 %v317_v4  ;;  %v323_v11 = vsel %vm316_vm0, %v1528_v9, 0.0  ;;  %v1538_v13 = vld [vmem:[%s1494_s7 + $0x10] sm:$0xff]  ;;  %v350_v14 = vsel %vm316_vm0, %v1535_v12, 0.0  ;;  %v373_v17 = vmul.f32 %v1508_v1, %v1508_v1  ;;  %v416_v22 = vsel %vm316_vm0, %v406_v20, 0.0  ;;  %v1572_v33 = vld [vmem:[%s1486_s17 + $0x20] sm:$0xff]  ;;  %v1579_v36 = vld [vmem:[%s1494_s7 + $0x28] sm:$0xff] }
  0x5c   : > { %v347_v15 = vsel %vm316_vm0, %v1538_v13, 0.0  ;;  %v384_v18 = vsel %vm316_vm0, %v374_v16, 0.0  ;;  %v413_v23 = vsel %vm316_vm0, %v405_v21, 0.0  ;;  %v376_v24 = vmul.f32 %v1525_v8, %v1525_v8  ;;  %v1582_v37 = vld [vmem:[%s1494_s7 + $0x20] sm:$0xff]  ;;  %v1589_v40 = vld [vmem:[%s1486_s17 + $0x38] sm:$0xff]  ;;  %v1592_v41 = vld [vmem:[%s1486_s17 + $0x30] sm:$0xff] }
  0x5d   : > { %v381_v19 = vsel %vm316_vm0, %v373_v17, 0.0  ;;  %v375_v25 = vmul.f32 %v1528_v9, %v1528_v9  ;;  %v408_v28 = vmul.f32 %v1535_v12, %v1535_v12  ;;  %v407_v29 = vmul.f32 %v1538_v13, %v1538_v13  ;;  %v1599_v44 = vld [vmem:[%s1494_s7 + $0x38] sm:$0xff]  ;;  %v1602_v45 = vld [vmem:[%s1494_s7 + $0x30] sm:$0xff]  ;;  %s814_s29 = sshll.u32 %s1680_s22, 4  ;;  %s800_s14 = scalar_lea.sflag [#allocation4], %s1479_s0  ;;  %s1689_s29 = int_to_ptr.vmem [resolvable:$true] %s814_s29 }
  0x5e   : > { %345 = vadd.xlane.f32.xlu1 %v344_v6  ;;  %v390_v26 = vsel %vm316_vm0, %v376_v24, 0.0  ;;  %v332_v34 = vsel %vm316_vm0, %v1569_v32, 0.0  ;;  %v329_v35 = vsel %vm316_vm0, %v1572_v33, 0.0  ;;  %v356_v38 = vsel %vm316_vm0, %v1579_v36, 0.0  ;;  %v1109_v58 = vld [vmem:[#allocation7 + $0x38] sm:$0xff]   ;;  %v1111_v3 = vld [vmem:[#allocation7 + $0x30] sm:$0xff]  }
  0x5f   : > { %321 = vadd.xlane.f32.xlu0 %v320_v7  ;;  %v387_v27 = vsel %vm316_vm0, %v375_v25, 0.0  ;;  %v422_v30 = vsel %vm316_vm0, %v408_v28, 0.0  ;;  %v419_v31 = vsel %vm316_vm0, %v407_v29, 0.0  ;;  %v353_v39 = vsel %vm316_vm0, %v1582_v37, 0.0  ;;  %v1110_v59 = vld [vmem:[#allocation7 + $0x18] sm:$0xff]   ;;  %992 = vmatprep.subr.bf16.mxu0 %v1109_v58  ;;  %v1112_v4 = vld [vmem:[#allocation7 + $0x10] sm:$0xff]  }
  0x60   : > { %v338_v42 = vsel %vm316_vm0, %v1589_v40, 0.0  ;;  %v335_v43 = vsel %vm316_vm0, %v1592_v41, 0.0  ;;  %v362_v46 = vsel %vm316_vm0, %v1599_v44, 0.0  ;;  %v359_v47 = vsel %vm316_vm0, %v1602_v45, 0.0  ;;  %1008 = vmatprep.subr.bf16.mxu1 %v1110_v59  ;;  %993 = vmatpush3.bf16.msra.mxu0 %v1109_v58  ;;  %s1216_s18 = scalar_lea.vmem %s1689_s29, 1024  ;;  %p1778_p1 = scmp.ne.s32.totalorder %s1763_s26, 0 }
  0x61   : > { %v378_v48 = vmul.f32 %v1569_v32, %v1569_v32  ;;  %v377_v49 = vmul.f32 %v1572_v33, %v1572_v33  ;;  %v410_v52 = vmul.f32 %v1579_v36, %v1579_v36  ;;  %v409_v53 = vmul.f32 %v1582_v37, %v1582_v37  ;;  %1009 = vmatpush3.bf16.msra.mxu1 %v1110_v59  ;;  %p1217_p0 = scmp.ne.s32.totalorder %s1689_s29, %s1216_s18  ;;  %s1314_s9 = smov [#allocation8]  }
  0x62   : > { %327 = vadd.xlane.f32.xlu1 %v326_v10  ;;  %v380_v56 = vmul.f32 %v1589_v40, %v1589_v40  ;;  %v379_v57 = vmul.f32 %v1592_v41, %v1592_v41  ;;  %v412_v62 = vmul.f32 %v1599_v44, %v1599_v44  ;;  %v411_v63 = vmul.f32 %v1602_v45, %v1602_v45  ;;  %v1113_v10 = vld [vmem:[#allocation7 + $0x28] sm:$0xff]   ;;  %s1220_s30 = sshll.u32 %s1314_s9, 4  ;;  %s1221_s30 = int_to_ptr.vmem [resolvable:$false] %s1220_s30 }
  0x63   : > { %324 = vadd.xlane.f32.xlu0 %v323_v11  ;;  %v396_v50 = vsel %vm316_vm0, %v378_v48, 0.0  ;;  %v393_v51 = vsel %vm316_vm0, %v377_v49, 0.0  ;;  %v428_v54 = vsel %vm316_vm0, %v410_v52, 0.0  ;;  %v425_v55 = vsel %vm316_vm0, %v409_v53, 0.0  ;;  %994 = vmatprep.subr.bf16.mxu0 %v1111_v3  ;;  %v1114_v11 = vld [vmem:[#allocation7 + $0x8] sm:$0xff]   ;;  %p1218_p4 = pnand %p1217_p0, %p1778_p1  ;;  %s1222_s13 = scalar_lea.vmem %s1221_s30, 2048 }
  0x64   : > { %v402_v60 = vsel %vm316_vm0, %v380_v56, 0.0  ;;  %v399_v61 = vsel %vm316_vm0, %v379_v57, 0.0  ;;  %v434_v6 = vsel %vm316_vm0, %v412_v62, 0.0  ;;  %v431_v7 = vsel %vm316_vm0, %v411_v63, 0.0  ;;  %1010 = vmatprep.subr.bf16.mxu1 %v1112_v4  ;;  %995 = vmatpush3.bf16.msra.mxu0 %v1111_v3  ;;  %p1223_p10 = scmp.lt.s32.totalorder %s1689_s29, %s1221_s30  ;;  %p1224_p11 = scmp.lt.s32.totalorder %s1222_s13, %s1216_s18 }
  0x65   : > { %1011 = vmatpush3.bf16.msra.mxu1 %v1112_v4  ;;  %996 = vmatprep.subr.bf16.mxu0 %v1113_v10  ;;  %p1219_p6 = pneg %p1218_p4 }
  0x66   : > { %351 = vadd.xlane.f32.xlu1 %v350_v14  ;;  %1012 = vmatprep.subr.bf16.mxu1 %v1114_v11  ;;  %v1115_v14 = vld [vmem:[#allocation7 + $0x20] sm:$0xff]   ;;  %p1225_p13 = por %p1224_p11, %p1223_p10 }
  0x67   : > { %348 = vadd.xlane.f32.xlu0 %v347_v15  ;;  %v1116_v15 = vld [vmem:[#allocation7] sm:$0xff]  }
  0x68   : > { %997 = vmatpush3.bf16.msra.mxu0 %v1113_v10  ;;  %p1226_p3 = pnand %p1225_p13, %p1219_p6 }
  0x69   : > { %1013 = vmatpush3.bf16.msra.mxu1 %v1114_v11  ;;  %998 = vmatprep.subr.bf16.mxu0 %v1115_v14 }
  0x6a   : > { %385 = vadd.xlane.f32.xlu1 %v384_v18  ;;  %1014 = vmatprep.subr.bf16.mxu1 %v1116_v15 }
  0x6b   : > { %382 = vadd.xlane.f32.xlu0 %v381_v19 }
  0x6c   : > { %999 = vmatpush3.bf16.msra.mxu0 %v1115_v14 }
  0x6d   : > { %1015 = vmatpush3.bf16.msra.mxu1 %v1116_v15 }
  0x6e   : > { %417 = vadd.xlane.f32.xlu1 %v416_v22 }
  0x6f   : > { %414 = vadd.xlane.f32.xlu0 %v413_v23 }
  0x72   : > { %391 = vadd.xlane.f32.xlu1 %v390_v26 }
  0x73   : > { %388 = vadd.xlane.f32.xlu0 %v387_v27 }
  0x76   : > { %423 = vadd.xlane.f32.xlu1 %v422_v30 }
  0x77   : > { %420 = vadd.xlane.f32.xlu0 %v419_v31 }
  0x7a   : > { %333 = vadd.xlane.f32.xlu1 %v332_v34 }
  0x7b   : > { %330 = vadd.xlane.f32.xlu0 %v329_v35 }
  0x7e   : > { %357 = vadd.xlane.f32.xlu1 %v356_v38 }
  0x7f   : > { %354 = vadd.xlane.f32.xlu0 %v353_v39 }
  0x82   : > { %339 = vadd.xlane.f32.xlu1 %v338_v42 }
  0x83   : > { %336 = vadd.xlane.f32.xlu0 %v335_v43 }
  0x86   : > { %363 = vadd.xlane.f32.xlu1 %v362_v46 }
  0x87   : > { %360 = vadd.xlane.f32.xlu0 %v359_v47 }
  0x8a   : > { %397 = vadd.xlane.f32.xlu1 %v396_v50 }
  0x8b   : > { %394 = vadd.xlane.f32.xlu0 %v393_v51 }
  0x8e   : > { %429 = vadd.xlane.f32.xlu1 %v428_v54 }
  0x8f   : > { %426 = vadd.xlane.f32.xlu0 %v425_v55 }
  0x92   : > { %403 = vadd.xlane.f32.xlu1 %v402_v60 }
  0x93   : > { %400 = vadd.xlane.f32.xlu0 %v399_v61 }
  0x96   : > { %435 = vadd.xlane.f32.xlu1 %v434_v6 }
  0x97   : > { %432 = vadd.xlane.f32.xlu0 %v431_v7 }
  0xe3   : > { %v343_v16 = vpop.xlane.xlu1 %342 }
  0xe4   : > { %v319_v17 = vpop.xlane.xlu0 %318 }
  0xe5   : > { %v365_v24 = vadd.f32 %v343_v16, %v319_v17 }
  0xe7   : > { %v346_v18 = vpop.xlane.xlu1 %345  ;;  %v445_v28 = vmul.f32 0.0078125, %v365_v24 }
  0xe8   : > { %v322_v19 = vpop.xlane.xlu0 %321 }
  0xe9   : > { %v366_v25 = vadd.f32 %v346_v18, %v322_v19  ;;  %v461_v38 = vmul.f32 %v445_v28, %v445_v28 }
  0xeb   : > { %v328_v20 = vpop.xlane.xlu1 %327  ;;  %v446_v29 = vmul.f32 0.0078125, %v366_v25  ;;  %v501_v25 = vsub.f32 0.0, %v445_v28 }
  0xec   : > { %v325_v21 = vpop.xlane.xlu0 %324 }
  0xed   : > { %v462_v42 = vmul.f32 %v446_v29, %v446_v29 }
  0xef   : > { %v352_v22 = vpop.xlane.xlu1 %351 }
  0xf0   : > { %v349_v23 = vpop.xlane.xlu0 %348  ;;  %v368_v39 = vadd.f32 %v352_v22, %v328_v20  ;;  %v502_v22 = vsub.f32 0.0, %v446_v29 }
  0xf1   : > { %v367_v43 = vadd.f32 %v349_v23, %v325_v21 }
  0xf2   : > { %v1632_v52 = vmul.f32 0.0078125, %v368_v39 }
  0xf3   : > { %v386_v26 = vpop.xlane.xlu1 %385  ;;  %v1634_v53 = vmul.f32 0.0078125, %v367_v43 }
  0xf4   : > { %v383_v27 = vpop.xlane.xlu0 %382  ;;  %v464_v62 = vmul.f32 %v1632_v52, %v1632_v52 }
  0xf5   : > { %v463_v63 = vmul.f32 %v1634_v53, %v1634_v53 }
  0xf7   : > { %v418_v30 = vpop.xlane.xlu1 %417 }
  0xf8   : > { %v415_v31 = vpop.xlane.xlu0 %414  ;;  %v438_v34 = vadd.f32 %v418_v30, %v386_v26 }
  0xf9   : > { %v437_v35 = vadd.f32 %v415_v31, %v383_v27 }
  0xfa   : > { %v454_v46 = vmul.f32 0.0078125, %v438_v34 }
  0xfb   : > { %v453_v47 = vmul.f32 0.0078125, %v437_v35  ;;  %v392_v48 = vpop.xlane.xlu1 %391 }
  0xfc   : > { %v389_v49 = vpop.xlane.xlu0 %388  ;;  %v470_v50 = vsub.f32 %v454_v46, %v462_v42 }
  0xfd   : > { %v469_v51 = vsub.f32 %v453_v47, %v461_v38 }
  0xfe   : > { %v478_v54 = vmax.f32 %v470_v50, 0.0 }
  0xff   : > { %v477_v55 = vmax.f32 %v469_v51, 0.0  ;;  %v424_v56 = vpop.xlane.xlu1 %423 }
 0x100   : > { %v421_v57 = vpop.xlane.xlu0 %420  ;;  %v486_v58 = vadd.f32 1e-05, %v478_v54  ;;  %v440_v60 = vadd.f32 %v424_v56, %v392_v48 }
 0x101   : > { %v485_v59 = vadd.f32 1e-05, %v477_v55  ;;  %v439_v61 = vadd.f32 %v421_v57, %v389_v49 }
 0x102   : > { %1117 = vrsqrt.f32 %v486_v58  ;;  %v456_v3 = vmul.f32 0.0078125, %v440_v60 }
 0x103   : > { %v455_v4 = vmul.f32 0.0078125, %v439_v61  ;;  %1119 = vrsqrt.f32 %v485_v59  ;;  %v334_v6 = vpop.xlane.xlu1 %333 }
 0x104   : > { %v331_v7 = vpop.xlane.xlu0 %330  ;;  %v472_v10 = vsub.f32 %v456_v3, %v464_v62 }
 0x105   : > { %v471_v11 = vsub.f32 %v455_v4, %v463_v63 }
 0x106   : > { %v480_v14 = vmax.f32 %v472_v10, 0.0 }
 0x107   : > { %v479_v15 = vmax.f32 %v471_v11, 0.0  ;;  %v358_v16 = vpop.xlane.xlu1 %357 }
 0x108   : > { %v355_v17 = vpop.xlane.xlu0 %354  ;;  %v488_v18 = vadd.f32 1e-05, %v480_v14  ;;  %v370_v23 = vadd.f32 %v358_v16, %v334_v6 }
 0x109   : > { %v487_v19 = vadd.f32 1e-05, %v479_v15  ;;  %v369_v26 = vadd.f32 %v355_v17, %v331_v7 }
 0x10a   : > { %1121 = vrsqrt.f32 %v488_v18  ;;  %v1644_v46 = vmul.f32 0.0078125, %v370_v23 }
 0x10b   : > { %1123 = vrsqrt.f32 %v487_v19  ;;  %v340_v20 = vpop.xlane.xlu1 %339  ;;  %v1646_v47 = vmul.f32 0.0078125, %v369_v26 }
 0x10c   : > { %v337_v21 = vpop.xlane.xlu0 %336 }
 0x10f   : > { %v1118_v24 = vpop.eup %1117  ;;  %v364_v27 = vpop.xlane.xlu1 %363 }
 0x110   : > { %v361_v30 = vpop.xlane.xlu0 %360  ;;  %v1120_v31 = vpop.eup %1119  ;;  %v510_v34 = vmul.f32 %v1118_v24, %v502_v22  ;;  %v538_v35 = vmul.f32 %v1118_v24, %v1511_v2  ;;  %v518_v43 = vmul.f32 %v1118_v24, %v1518_v5  ;;  %v504_v2 = vsub.f32 0.0, %v1632_v52 }
 0x111   : > { %v509_v38 = vmul.f32 %v1120_v31, %v501_v25  ;;  %v537_v39 = vmul.f32 %v1120_v31, %v1505_v0  ;;  %v517_v42 = vmul.f32 %v1120_v31, %v1508_v1  ;;  %v503_v0 = vsub.f32 0.0, %v1634_v53 }
 0x112   : > { %v546_v29 = vadd.f32 %v538_v35, %v510_v34  ;;  %v526_v51 = vadd.f32 %v518_v43, %v510_v34  ;;  %v466_v1 = vmul.f32 %v1644_v46, %v1644_v46  ;;  %v465_v5 = vmul.f32 %v1646_v47, %v1646_v47 }
 0x113   : > { %v398_v28 = vpop.xlane.xlu1 %397  ;;  %v545_v49 = vadd.f32 %v537_v39, %v509_v38  ;;  %v525_v50 = vadd.f32 %v517_v42, %v509_v38  ;;  %v372_v57 = vadd.f32 %v364_v27, %v340_v20  ;;  %v371_v7 = vadd.f32 %v361_v30, %v337_v21 }
 0x114   : > { %v395_v48 = vpop.xlane.xlu0 %394 }
 0x115   : > { %v553_v54 = vpack.c.bf16 %v546_v29, %v545_v49  ;;  %v533_v55 = vpack.c.bf16 %v526_v51, %v525_v50  ;;  %v452_v23 = vmul.f32 0.0078125, %v372_v57  ;;  %v451_v25 = vmul.f32 0.0078125, %v371_v7 }
 0x116   : > { %v506_v50 = vsub.f32 0.0, %v1644_v46 }
 0x117   : > { %v1122_v56 = vpop.eup %1121  ;;  %1000 = vmatprep.mubr.msk.bf16.mxu0 %vm316_vm0, %v553_v54  ;;  %1016 = vmatprep.mubr.msk.bf16.mxu1 %vm316_vm0, %v533_v55  ;;  %v430_v58 = vpop.xlane.xlu1 %429  ;;  %v468_v34 = vmul.f32 %v452_v23, %v452_v23  ;;  %v467_v35 = vmul.f32 %v451_v25, %v451_v25  ;;  %v505_v54 = vsub.f32 0.0, %v1646_v47  ;;  %v507_v47 = vsub.f32 0.0, %v451_v25 }
 0x118   : > { %v427_v59 = vpop.xlane.xlu0 %426  ;;  %v1124_v60 = vpop.eup %1123  ;;  %v442_v61 = vadd.f32 %v430_v58, %v398_v28  ;;  %v512_v52 = vmul.f32 %v1122_v56, %v504_v2  ;;  %v540_v63 = vmul.f32 %v1122_v56, %v1535_v12  ;;  %v520_v6 = vmul.f32 %v1122_v56, %v1525_v8 }
 0x119   : > { %v441_v62 = vadd.f32 %v427_v59, %v395_v48  ;;  %v511_v53 = vmul.f32 %v1124_v60, %v503_v0  ;;  %v539_v3 = vmul.f32 %v1124_v60, %v1538_v13  ;;  %v519_v4 = vmul.f32 %v1124_v60, %v1528_v9 }
 0x11a   : > { %v458_v10 = vmul.f32 0.0078125, %v442_v61  ;;  %v548_v14 = vadd.f32 %v540_v63, %v512_v52  ;;  %v528_v19 = vadd.f32 %v520_v6, %v512_v52  ;;  %v508_v52 = vsub.f32 0.0, %v452_v23 }
 0x11b   : > { %v457_v11 = vmul.f32 0.0078125, %v441_v62  ;;  %v404_v15 = vpop.xlane.xlu1 %403  ;;  %v547_v17 = vadd.f32 %v539_v3, %v511_v53  ;;  %v527_v18 = vadd.f32 %v519_v4, %v511_v53 }
 0x11c   : > { %v401_v16 = vpop.xlane.xlu0 %400  ;;  %v474_v20 = vsub.f32 %v458_v10, %v466_v1 }
 0x11d   : > { %v473_v22 = vsub.f32 %v457_v11, %v465_v5  ;;  %v554_v12 = vpack.c.bf16 %v548_v14, %v547_v17  ;;  %v534_v24 = vpack.c.bf16 %v528_v19, %v527_v18 }
 0x11e   : > { %v482_v13 = vmax.f32 %v474_v20, 0.0 }
 0x11f   : > { %v481_v26 = vmax.f32 %v473_v22, 0.0  ;;  %1001 = vmatmul.mubr.msk.bf16.vlgmr.msra.gmra.mxu0 %vm316_vm0, %v554_v12  ;;  %1017 = vmatmul.mubr.msk.bf16.vlgmr.msra.gmra.mxu1 %vm316_vm0, %v534_v24  ;;  %v436_v8 = vpop.xlane.xlu1 %435 }
 0x120   : > { %v433_v9 = vpop.xlane.xlu0 %432  ;;  %v490_v21 = vadd.f32 1e-05, %v482_v13  ;;  %v444_v30 = vadd.f32 %v436_v8, %v404_v15 }
 0x121   : > { %v489_v27 = vadd.f32 1e-05, %v481_v26  ;;  %v443_v31 = vadd.f32 %v433_v9, %v401_v16 }
 0x122   : > { %1125 = vrsqrt.f32 %v490_v21  ;;  %v460_v38 = vmul.f32 0.0078125, %v444_v30 }
 0x123   : > { %v459_v39 = vmul.f32 0.0078125, %v443_v31  ;;  %1127 = vrsqrt.f32 %v489_v27 }
 0x124   : > { %v476_v42 = vsub.f32 %v460_v38, %v468_v34 }
 0x125   : > { %v475_v43 = vsub.f32 %v459_v39, %v467_v35 }
 0x126   : > { %v484_v29 = vmax.f32 %v476_v42, 0.0 }
 0x127   : > { %v483_v28 = vmax.f32 %v475_v43, 0.0 }
 0x128   : > { %v492_v48 = vadd.f32 1e-05, %v484_v29 }
 0x129   : > { %v491_v49 = vadd.f32 1e-05, %v483_v28 }
 0x12a   : > { %1129 = vrsqrt.f32 %v492_v48 }
 0x12b   : > { %1131 = vrsqrt.f32 %v491_v49 }
 0x12f   : > { %v1126_v51 = vpop.eup %1125 }
 0x130   : > { %v1128_v55 = vpop.eup %1127  ;;  %v514_v2 = vmul.f32 %v1126_v51, %v506_v50  ;;  %v542_v56 = vmul.f32 %v1126_v51, %v1579_v36  ;;  %v522_v0 = vmul.f32 %v1126_v51, %v1569_v32 }
 0x131   : > { %v513_v1 = vmul.f32 %v1128_v55, %v505_v54  ;;  %v541_v5 = vmul.f32 %v1128_v55, %v1582_v37  ;;  %v521_v57 = vmul.f32 %v1128_v55, %v1572_v33 }
 0x132   : > { %v550_v58 = vadd.f32 %v542_v56, %v514_v2  ;;  %v530_v59 = vadd.f32 %v522_v0, %v514_v2 }
 0x133   : > { %v549_v60 = vadd.f32 %v541_v5, %v513_v1  ;;  %v529_v61 = vadd.f32 %v521_v57, %v513_v1 }
 0x135   : > { %v555_v62 = vpack.c.bf16 %v550_v58, %v549_v60  ;;  %v535_v46 = vpack.c.bf16 %v530_v59, %v529_v61 }
 0x137   : > { %v1130_v63 = vpop.eup %1129  ;;  %1004 = vmatprep.mubr.msk.bf16.mxu0 %vm316_vm0, %v555_v62  ;;  %1020 = vmatprep.mubr.msk.bf16.mxu1 %vm316_vm0, %v535_v46 }
 0x138   : > { %v1132_v36 = vpop.eup %1131  ;;  %v516_v32 = vmul.f32 %v1130_v63, %v508_v52  ;;  %v544_v53 = vmul.f32 %v1130_v63, %v1599_v44  ;;  %v524_v37 = vmul.f32 %v1130_v63, %v1589_v40  ;;  %v967_v40 = vld [vmem:[%s1748_s3] ss:$0 sm:$0xff] }
 0x139   : > { %v515_v33 = vmul.f32 %v1132_v36, %v507_v47  ;;  %v543_v3 = vmul.f32 %v1132_v36, %v1602_v45  ;;  %v523_v4 = vmul.f32 %v1132_v36, %v1592_v41 }
 0x13a   : > { %v552_v6 = vadd.f32 %v544_v53, %v516_v32  ;;  %v532_v7 = vadd.f32 %v524_v37, %v516_v32 }
 0x13b   : > { %v551_v10 = vadd.f32 %v543_v3, %v515_v33  ;;  %v531_v11 = vadd.f32 %v523_v4, %v515_v33 }
 0x13d   : > { %v556_v14 = vpack.c.bf16 %v552_v6, %v551_v10  ;;  %v536_v15 = vpack.c.bf16 %v532_v7, %v531_v11 }
 0x13f   : > { %1005 = vmatmul.mubr.msk.bf16.gmra.mxu0 %vm316_vm0, %v556_v14  ;;  %1021 = vmatmul.mubr.msk.bf16.gmra.mxu1 %vm316_vm0, %v536_v15 }
 0x1df   : > { %v1002_v16 = vpop.f32.mrf.mxu0  ;;  %v1018_v44 = vpop.f32.mrf.mxu1 }
 0x1e0   : > { %v754_v45 = vadd.f32 %v1018_v44, %v1002_v16 }
 0x1e1   : > { %v644_v17 = vpop.f32.mrf.mxu0  ;;  %v745_v41 = vpop.f32.mrf.mxu1 }
 0x1e2   : > { %v785_v18 = vadd.f32 %v967_v40, %v754_v45  ;;  %v746_v19 = vadd.f32 %v745_v41, %v644_v17 }
 0x1e3   : > { %v1003_v20 = vpop.f32.mrf.mxu0  ;;  %v1019_v22 = vpop.f32.mrf.mxu1 }
 0x1e4   : > { %793 = vst [vmem:[%s1680_s22 + $0x10] sm:$0xff] %v785_v18  ;;  %v783_v23 = vadd.f32 %v967_v40, %v746_v19  ;;  %v757_v12 = vadd.f32 %v1019_v22, %v1003_v20 }
 0x1e5   : > { %v647_v24 = vpop.f32.mrf.mxu0  ;;  %v748_v25 = vpop.f32.mrf.mxu1 }
 0x1e6   : > { %791 = vst [vmem:[%s1680_s22] sm:$0xff] %v783_v23  ;;  %v786_v13 = vadd.f32 %v967_v40, %v757_v12  ;;  %v749_v26 = vadd.f32 %v748_v25, %v647_v24 }
 0x1e8   : > { %794 = vst [vmem:[%s1680_s22 + $0x18] sm:$0xff] %v786_v13  ;;  %v784_v8 = vadd.f32 %v967_v40, %v749_v26 }
 0x1ea   : > { %792 = vst [vmem:[%s1680_s22 + $0x8] sm:$0xff] %v784_v8 }
 0x1ff   : > { %v1006_v9 = vpop.f32.mrf.mxu0  ;;  %v1022_v21 = vpop.f32.mrf.mxu1 }
 0x200   : > { %v770_v27 = vadd.f32 %v1022_v21, %v1006_v9 }
 0x201   : > { %v660_v30 = vpop.f32.mrf.mxu0  ;;  %v761_v31 = vpop.f32.mrf.mxu1 }
 0x202   : > { %v789_v34 = vadd.f32 %v967_v40, %v770_v27  ;;  %v762_v35 = vadd.f32 %v761_v31, %v660_v30 }
 0x203   : > { %v1007_v38 = vpop.f32.mrf.mxu0  ;;  %v1023_v39 = vpop.f32.mrf.mxu1 }
 0x204   : > { %797 = vst [vmem:[%s1680_s22 + $0x30] sm:$0xff] %v789_v34  ;;  %v787_v42 = vadd.f32 %v967_v40, %v762_v35  ;;  %v773_v43 = vadd.f32 %v1023_v39, %v1007_v38 }
 0x205   : > { %v663_v29 = vpop.f32.mrf.mxu0  ;;  %v764_v28 = vpop.f32.mrf.mxu1 }
 0x206   : > { %795 = vst [vmem:[%s1680_s22 + $0x20] sm:$0xff] %v787_v42  ;;  %v790_v48 = vadd.f32 %v967_v40, %v773_v43  ;;  %v765_v49 = vadd.f32 %v764_v28, %v663_v29 }
 0x208   : > { %798 = vst [vmem:[%s1680_s22 + $0x38] sm:$0xff] %v790_v48  ;;  %v788_v50 = vadd.f32 %v967_v40, %v765_v49 }
 0x20a   : > { %796 = vst [vmem:[%s1680_s22 + $0x28] sm:$0xff] %v788_v50 }
 0x20b   : > { %1229 = shalt.err (!%p1226_p3)
}
 0x20c   : > { %s1230_s24 = scalar_lea.hbm %s1695_s27, 1024  ;;  %s1234_s5 = scalar_lea.hbm %s1749_s4, 2048 }
 0x20d   : > { %p1231_p7 = scmp.ne.s32.totalorder %s1695_s27, %s1230_s24  ;;  %p1235_p5 = scmp.lt.s32.totalorder %s1695_s27, %s1749_s4 }
 0x20e   : > { %p1236_p12 = scmp.lt.s32.totalorder %s1234_s5, %s1230_s24 }
 0x20f   : > { %p1232_p8 = pnand %p1231_p7, %p1778_p1 }
 0x210   : > { %p1237_p2 = por %p1236_p12, %p1235_p5 }
 0x211   : > { %p1233_p9 = pneg %p1232_p8 }
 0x213   : > { %p1238_p0 = pnand %p1237_p2, %p1233_p9 }
 0x215   : > { %1241 = shalt.err (!%p1238_p0)
}
 0x216   : > { %s1315_s17 = smov 128   ;;  %s1316_s28 = smov 8  }
 0x217   : > { %1032 = dma.vmem_to_hbm [thread:$0]  (%p1778_p1), %s1689_s29, 1024, %s1695_s27, %s800_s14, %s1315_s17, %s1315_s17, %s1316_s28  }
 0x218 PF: > { %s1779_s6 = sld [smem:[#allocation13_spill]]  ;;  %p1782_p6 = scmp.ge.s32.totalorder %s1304_s20, 2 }
 0x219   : > { %s1780_s7 = sld [smem:[#allocation15_spill]] }
 0x21e   : > { %s829_s21 = sand.u32 1, %s1779_s6  }
 0x21f   : > { %p1781_p4 = scmp.ne.s32.totalorder %s1780_s7, 0  ;;  %s830_s25 = scalar_lea.sflag [#allocation4], %s829_s21 }
 0x221   : > { %p1046_p10 = pnand %p1782_p6, %p1781_p4 }
 0x223   : > { %p1047_p11 = pneg %p1046_p10 }
 0x225   : > { %1279 = dma.done.wait (%p1047_p11), %s830_s25, 1024  }
 0x226   : > { %1281 = vsyncadd (%p1047_p11), %s830_s25, 4294966272  ;;  %s23_s20 = sadd.s32 1, %s1304_s20   ;;  %s1783_s22 = sld [smem:[#allocation14_spill]] }
 0x227   : > { %p20_p13 = scmp.ge.s32.totalorder %s23_s20, 4   ;;  %s1784_s17 = sld [smem:[#allocation17_spill]] }
 0x228   : > { %s1785_s26 = sld [smem:[#allocation16_spill]]  ;;  %s1786_s15 = smov %s1288_s16 }
 0x229   : > { %s1788_s18 = smov %s1300_s19 }
 0x22a   :  { %22 = sbr.rel (!%p20_p13) target bundleno = 11 (0xb), region = 99 }
 0x22c   : > { %s1787_s16 = smov %s1783_s22 }
 0x22e   : > { %s1789_s19 = smov %s1785_s26 }
 0x22f   :  { %835 = vsyncpa [#allocation3], 1 }
 0x230   :  { %837 = vsyncpa [#allocation3 + $0x1], 1 }
 0x231   :  { %838 = vsyncpa [#allocation6], 1 }
 0x232   :  { %840 = vsyncpa [#allocation6 + $0x1], 1 }
 0x233   :  { %841 = vsyncpa [#allocation4], 1 }
 0x234   :  { %843 = vsyncpa [#allocation4 + $0x1], 1 }

</bundles_post_ra>
